<compile_context>
chip_gen: v7x
topology: tpu7x:2x2x1
jax: 0.10.0
libtpu: 0.0.40
codegen_flags: <defaults>
</compile_context>

<pallas_src>
import jax
import jax.numpy as jnp
from jax.experimental import pallas as pl
from jax.experimental.pallas import tpu as pltpu


def _mlp_kernel(x_ref, w1_ref, w2_ref, aux_ref, b3_ref, o_ref):
    # x_ref:   (TB, D) bf16  -- the only per-step DMA that scales with batch
    # w1_ref:  (D, H)  bf16  (resident: constant index_map)
    # w2_ref:  (H, H)  bf16  (resident)
    # aux_ref: (8, H)  f32   row 0 = b1, row 1 = b2, row 2 = w3 (as a row)
    # b3_ref:  (1,)    f32   SMEM scalar
    # o_ref:   (1, TB) f32   lane-dense (batch on lanes)
    b1 = aux_ref[0:1, :]
    b2 = aux_ref[1:2, :]
    w3 = aux_ref[2:3, :]

    # Layer 1: bf16 MXU operands, f32 accumulation; bias + ReLU in f32 on the VPU.
    h = jnp.dot(x_ref[...], w1_ref[...], preferred_element_type=jnp.float32)   # (TB, H)
    h = jnp.maximum(h + b1, 0.0)

    # Layer 2: cast activations to bf16 only to feed the MXU; math stays f32.
    h = jnp.dot(h.astype(jnp.bfloat16), w2_ref[...],
                preferred_element_type=jnp.float32)                            # (TB, H)
    h = jnp.maximum(h + b2, 0.0)

    # Layer 3 (H -> 1): VPU multiply + lane reduce (XLU), not a 1-column matmul.
    z = jnp.sum(h * w3, axis=-1)                                               # (TB,)
    # Relayout to the lane-dense (1, TB) output BEFORE the EUP sigmoid, then add b3.
    z = z[None, :] + b3_ref[0]
    o_ref[...] = jax.nn.sigmoid(z).astype(o_ref.dtype)


def _choose_batch_tile(B, tb_max=1024):
    """Small batches: one grid step. Large batches: big 128-aligned tiles (capped at
    tb_max) with >= 2 grid steps so the 'parallel' axis can use both v7x TensorCores."""
    if B <= 256:
        return pl.cdiv(B, 8) * 8            # single step, sublane-aligned
    half = max(128, (B // 2) // 128 * 128)  # aim for >= 2 steps
    return min(tb_max, half)


def classification_head_forward(similarity, params, *, tb_max=1024):
    """similarity: (B, D) array.  params: dict of w1,b1,w2,b2,w3,b3 (weights stored (in,out))."""
    w1, b1 = params["w1"], params["b1"]
    w2, b2 = params["w2"], params["b2"]
    w3, b3 = params["w3"], params["b3"]

    B, D = similarity.shape
    H = w1.shape[1]

    # bf16 MXU operands; everything else f32.
    x = similarity.astype(jnp.bfloat16)
    w1b = w1.astype(jnp.bfloat16)
    w2b = w2.astype(jnp.bfloat16)

    tb = _choose_batch_tile(B, tb_max)
    Bp = pl.cdiv(B, tb) * tb                # pad the batch instead of asserting
    if Bp != B:
        x = jnp.pad(x, ((0, Bp - B), (0, 0)))

    # Merge b1 / b2 / w3-row into one sublane-padded (8, H) f32 aux block.
    aux = jnp.zeros((8, H), jnp.float32)
    aux = aux.at[0, :].set(b1.astype(jnp.float32))
    aux = aux.at[1, :].set(b2.astype(jnp.float32))
    aux = aux.at[2, :].set(w3.reshape(H).astype(jnp.float32))
    b3r = b3.reshape(1).astype(jnp.float32)

    grid = (Bp // tb,)
    out = pl.pallas_call(
        _mlp_kernel,
        out_shape=jax.ShapeDtypeStruct((1, Bp), jnp.float32),    # output pinned to f32
        grid=grid,
        in_specs=[
            pl.BlockSpec((tb, D), lambda i: (i, 0)),             # x tile (streams)
            pl.BlockSpec((D, H), lambda i: (0, 0)),              # w1 (resident)
            pl.BlockSpec((H, H), lambda i: (0, 0)),              # w2 (resident)
            pl.BlockSpec((8, H), lambda i: (0, 0)),              # aux: b1, b2, w3 row
            pl.BlockSpec(memory_space=pltpu.MemorySpace.SMEM),   # b3 scalar
        ],
        out_specs=pl.BlockSpec((1, tb), lambda i: (0, i)),       # lane-dense output
        compiler_params=pltpu.CompilerParams(
            dimension_semantics=("parallel",)),
    )(x, w1b, w2b, aux, b3r)
    return out.reshape(Bp, 1)[:B]


def init_params(key, projection_size=512, hidden_size=128, dtype=jnp.float32):
    """Deterministic synthetic init matching nn.Linear shapes.
    PyTorch stores weight as (out, in); we store the transpose (in, out)."""
    ks = jax.random.split(key, 6)

    def uniform_linear(kw, kb, fan_in, fan_out):
        bound = 1.0 / jnp.sqrt(fan_in)
        w = jax.random.uniform(kw, (fan_in, fan_out), dtype, -bound, bound)
        b = jax.random.uniform(kb, (fan_out,), dtype, -bound, bound)
        return w, b

    w1, b1 = uniform_linear(ks[0], ks[1], projection_size, hidden_size)
    w2, b2 = uniform_linear(ks[2], ks[3], hidden_size, hidden_size)
    w3, b3 = uniform_linear(ks[4], ks[5], hidden_size, 1)
    return {"w1": w1, "b1": b1, "w2": w2, "b2": b2, "w3": w3, "b3": b3}


def _reference_forward_bf16(x, p):
    """Mirrors the kernel's numerics: bf16 MXU operands, f32 accumulation/elementwise."""
    h = jnp.dot(x.astype(jnp.bfloat16), p["w1"].astype(jnp.bfloat16),
                preferred_element_type=jnp.float32) + p["b1"]
    h = jnp.maximum(h, 0.0)
    h = jnp.dot(h.astype(jnp.bfloat16), p["w2"].astype(jnp.bfloat16),
                preferred_element_type=jnp.float32) + p["b2"]
    h = jnp.maximum(h, 0.0)
    return jax.nn.sigmoid(h @ p["w3"] + p["b3"])


def _reference_forward_f32(x, p):
    h = jnp.maximum(x @ p["w1"] + p["b1"], 0.0)
    h = jnp.maximum(h @ p["w2"] + p["b2"], 0.0)
    return jax.nn.sigmoid(h @ p["w3"] + p["b3"])


if __name__ == "__main__":
    key = jax.random.PRNGKey(0)
    k_param, k_x = jax.random.split(key)

    # projection_size = clipmodel.text_projection.shape[1]; use CLIP's 512.
    B, D = 16, 512
    params = init_params(k_param, projection_size=D, hidden_size=128)
    similarity = jax.random.normal(k_x, (B, D), dtype=jnp.float32)

    # Small-batch path (grid=(1,)).
    out = jax.block_until_ready(classification_head_forward(similarity, params))
    ref = _reference_forward_bf16(similarity, params)
    ref_f32 = _reference_forward_f32(similarity, params)
    assert out.shape == (B, 1)
    assert jnp.allclose(out, ref, atol=1e-4, rtol=1e-4)
    assert jnp.allclose(out, ref_f32, atol=5e-2)   # bf16-operand drift only

    # Large, non-divisible batch path (padding + multi-step parallel grid).
    B2 = 300
    sim2 = jax.random.normal(jax.random.PRNGKey(1), (B2, D), dtype=jnp.float32)
    out2 = jax.block_until_ready(classification_head_forward(sim2, params))
    ref2 = _reference_forward_bf16(sim2, params)
    assert out2.shape == (B2, 1)
    assert jnp.allclose(out2, ref2, atol=1e-4, rtol=1e-4)

    print("KERNEL_OK")
</pallas_src>

<mosaic_0001>
module attributes {stable_mosaic.version = 11 : i64} {
  func.func @_mlp_kernel(%arg0: i32, %arg1: memref<16x512xbf16, #tpu.memory_space<vmem>>, %arg2: memref<512x128xbf16, #tpu.memory_space<vmem>>, %arg3: memref<128x128xbf16, #tpu.memory_space<vmem>>, %arg4: memref<8x128xf32, #tpu.memory_space<vmem>>, %arg5: memref<1xf32, #tpu.memory_space<smem>>, %arg6: memref<1x16xf32, #tpu.memory_space<vmem>>) attributes {dimension_semantics = [#tpu.dimension_semantics<parallel>], iteration_bounds = array<i64: 1>, scalar_prefetch = 0 : i64, scratch_operands = 0 : i64, tpu.core_type = #tpu.core_type<tc>, window_params = [{transform_indices = @transform_0, window_bounds = array<i64: 16, 512>}, {pipeline_mode = #tpu.pipeline_mode<synchronous>, transform_indices = @transform_1, window_bounds = array<i64: 512, 128>}, {pipeline_mode = #tpu.pipeline_mode<synchronous>, transform_indices = @transform_2, window_bounds = array<i64: 128, 128>}, {pipeline_mode = #tpu.pipeline_mode<synchronous>, transform_indices = @transform_3, window_bounds = array<i64: 8, 128>}, {transform_indices = @transform_4, window_bounds = array<i64: 1>}, {transform_indices = @transform_5, window_bounds = array<i64: 1, 16>}]} {
    %c0 = arith.constant 0 : index
    %c0_0 = arith.constant 0 : index
    %0 = vector.load %arg4[%c0, %c0_0] : memref<8x128xf32, #tpu.memory_space<vmem>>, vector<1x128xf32>
    %c1 = arith.constant 1 : index
    %c0_1 = arith.constant 0 : index
    %1 = vector.load %arg4[%c1, %c0_1] : memref<8x128xf32, #tpu.memory_space<vmem>>, vector<1x128xf32>
    %c2 = arith.constant 2 : index
    %c0_2 = arith.constant 0 : index
    %2 = vector.load %arg4[%c2, %c0_2] : memref<8x128xf32, #tpu.memory_space<vmem>>, vector<1x128xf32>
    %c0_3 = arith.constant 0 : index
    %c0_4 = arith.constant 0 : index
    %3 = vector.load %arg1[%c0_3, %c0_4] : memref<16x512xbf16, #tpu.memory_space<vmem>>, vector<16x512xbf16>
    %c0_5 = arith.constant 0 : index
    %c0_6 = arith.constant 0 : index
    %4 = vector.load %arg2[%c0_5, %c0_6] : memref<512x128xbf16, #tpu.memory_space<vmem>>, vector<512x128xbf16>
    %cst = arith.constant dense<0.000000e+00> : vector<16x128xf32>
    %5 = tpu.matmul %3, %4, %cst {dimension_numbers = #tpu.dot_dimension_numbers<[1], [0], [0], [1], [0, 0, 1, 1], [], []>} : vector<16x512xbf16>, vector<512x128xbf16>, vector<16x128xf32> -> vector<16x128xf32>
    %6 = vector.broadcast %0 : vector<1x128xf32> to vector<16x128xf32>
    %7 = arith.addf %5, %6 : vector<16x128xf32>
    %cst_7 = arith.constant 0.000000e+00 : f32
    %8 = vector.broadcast %cst_7 : f32 to vector<16x128xf32>
    %9 = arith.maximumf %7, %8 : vector<16x128xf32>
    %10 = arith.truncf %9 : vector<16x128xf32> to vector<16x128xbf16>
    %c0_8 = arith.constant 0 : index
    %c0_9 = arith.constant 0 : index
    %11 = vector.load %arg3[%c0_8, %c0_9] : memref<128x128xbf16, #tpu.memory_space<vmem>>, vector<128x128xbf16>
    %cst_10 = arith.constant dense<0.000000e+00> : vector<16x128xf32>
    %12 = tpu.matmul %10, %11, %cst_10 {dimension_numbers = #tpu.dot_dimension_numbers<[1], [0], [0], [1], [0, 0, 1, 1], [], []>} : vector<16x128xbf16>, vector<128x128xbf16>, vector<16x128xf32> -> vector<16x128xf32>
    %13 = vector.broadcast %1 : vector<1x128xf32> to vector<16x128xf32>
    %14 = arith.addf %12, %13 : vector<16x128xf32>
    %cst_11 = arith.constant 0.000000e+00 : f32
    %15 = vector.broadcast %cst_11 : f32 to vector<16x128xf32>
    %16 = arith.maximumf %14, %15 : vector<16x128xf32>
    %17 = vector.broadcast %2 : vector<1x128xf32> to vector<16x128xf32>
    %18 = arith.mulf %16, %17 : vector<16x128xf32>
    %cst_12 = arith.constant dense<0.000000e+00> : vector<16xf32>
    %19 = vector.multi_reduction <add>, %18, %cst_12 [1] : vector<16x128xf32> to vector<16xf32>
    %20 = vector.shape_cast %19 : vector<16xf32> to vector<1x16xf32>
    %c0_13 = arith.constant 0 : index
    %21 = memref.load %arg5[%c0_13] : memref<1xf32, #tpu.memory_space<smem>>
    %22 = vector.broadcast %21 : f32 to vector<1x16xf32>
    %23 = arith.addf %20, %22 : vector<1x16xf32>
    %24 = arith.negf %23 : vector<1x16xf32>
    %25 = math.exp %24 : vector<1x16xf32>
    %cst_14 = arith.constant 1.000000e+00 : f32
    %26 = vector.broadcast %cst_14 : f32 to vector<1x16xf32>
    %27 = arith.addf %26, %25 : vector<1x16xf32>
    %28 = arith.divf %26, %27 : vector<1x16xf32>
    %c0_15 = arith.constant 0 : index
    %c0_16 = arith.constant 0 : index
    %29 = vector.load %arg6[%c0_15, %c0_16] : memref<1x16xf32, #tpu.memory_space<vmem>>, vector<1x16xf32>
    tpu.vector_store %arg6[%c0_15, %c0_16], %28 {strides = array<i32>} : memref<1x16xf32, #tpu.memory_space<vmem>>, vector<1x16xf32>,
    return
  }
  func.func @transform_0(%arg0: i32) -> (i32, i32) {
    %c0_i32 = arith.constant 0 : i32
    %c0_i32_0 = arith.constant 0 : i32
    return %arg0, %c0_i32 : i32, i32
  }
  func.func @transform_1(%arg0: i32) -> (i32, i32) {
    %c0_i32 = arith.constant 0 : i32
    %c0_i32_0 = arith.constant 0 : i32
    %c0_i32_1 = arith.constant 0 : i32
    return %c0_i32, %c0_i32_0 : i32, i32
  }
  func.func @transform_2(%arg0: i32) -> (i32, i32) {
    %c0_i32 = arith.constant 0 : i32
    %c0_i32_0 = arith.constant 0 : i32
    %c0_i32_1 = arith.constant 0 : i32
    return %c0_i32, %c0_i32_0 : i32, i32
  }
  func.func @transform_3(%arg0: i32) -> (i32, i32) {
    %c0_i32 = arith.constant 0 : i32
    %c0_i32_0 = arith.constant 0 : i32
    %c0_i32_1 = arith.constant 0 : i32
    return %c0_i32, %c0_i32_0 : i32, i32
  }
  func.func @transform_4(%arg0: i32) -> i32 {
    %c0_i32 = arith.constant 0 : i32
    %c0_i32_0 = arith.constant 0 : i32
    return %c0_i32 : i32
  }
  func.func @transform_5(%arg0: i32) -> (i32, i32) {
    %c0_i32 = arith.constant 0 : i32
    %c0_i32_0 = arith.constant 0 : i32
    return %c0_i32, %arg0 : i32, i32
  }
}

</mosaic_0001>

<bundles_post_ra>
// kernel: tpu_custom_call.1
= control target key start
LH: loop header
LB: loop body
LE: loop exit
PB: predicated region body
PF: predicated region fallthrough
CT: control target
= control target key end

     0   :  { %11 = vsyncpa [#allocation4], 0  ;;  %s993_s0 = inlined_call_operand.hbm [shape: bf16[16,512], index: 0, kind: input, shape index: {}]   ;;  %s994_s1 = inlined_call_operand.hbm [shape: bf16[512,128], index: 1, kind: input, shape index: {}]   ;;  %s995_s2 = inlined_call_operand.hbm [shape: bf16[128,128], index: 2, kind: input, shape index: {}]   ;;  %s996_s3 = inlined_call_operand.vmem [shape: f32[8,128], index: 3, kind: input, shape index: {}]   ;;  %s997_s4 = inlined_call_operand.<no memory space> [shape: f32[1], index: 4, kind: input, shape index: {}]   ;;  %s998_s5 = inlined_call_operand.hbm [shape: f32[1,16], index: 5, kind: output, shape index: {}]  }
   0x1   :  { %12 = vsyncpa [#allocation7], 0 }
   0x2   :  { %13 = vsyncpa [#allocation5], 0  ;;  %s887_s18 = smov [#allocation6]   ;;  %s793_s22 = scalar_lea.hbm %s994_s1, 4096 }
   0x3   :  { %s31_s19 = sshll.u32 %s887_s18, 4  ;;  %p794_p0 = scmp.ne.s32.totalorder %s994_s1, %s793_s22  ;;  %s32_s19 = int_to_ptr.vmem [resolvable:$true] %s31_s19 }
   0x4   :  { %p797_p1 = scmp.lt.u32.totalorder %s793_s22, %s994_s1 }
   0x6   :  { %p799_p2 = pnand %p797_p1, %p794_p0 }
   0x8   :  { %802 = shalt.err (!%p799_p2)
}
   0x9   :  { %s803_s27 = scalar_lea.vmem %s32_s19, 4096  ;;  %p808_p4 = scmp.lt.s32.totalorder %s32_s19, %s32_s19 }
   0xa   :  { %p804_p3 = scmp.ne.s32.totalorder %s32_s19, %s803_s27  ;;  %p809_p5 = scmp.lt.s32.totalorder %s803_s27, %s803_s27 }
   0xc   :  { %p810_p6 = por %p809_p5, %p808_p4 }
   0xe   :  { %p811_p7 = pnand %p810_p6, %p804_p3 }
  0x10   :  { %814 = shalt.err (!%p811_p7)
}
  0x11   :  { %s888_s28 = smov 64   ;;  %s889_s29 = smov 4  }
  0x12   :  { %37 = dma.hbm_to_vmem [thread:$0]  %s994_s1, 4096, %s32_s19, [#allocation7], %s888_s28, %s888_s28, %s889_s29  }
  0x13   :  { %s890_s7 = smov [#allocation3]   ;;  %s815_s11 = scalar_lea.hbm %s993_s0, 512 }
  0x14   :  { %s19_s8 = sshll.u32 %s890_s7, 4  ;;  %p816_p8 = scmp.ne.s32.totalorder %s993_s0, %s815_s11  ;;  %s20_s8 = int_to_ptr.vmem [resolvable:$true] %s19_s8 }
  0x15   :  { %p819_p9 = scmp.lt.u32.totalorder %s815_s11, %s993_s0 }
  0x17   :  { %p821_p10 = pnand %p819_p9, %p816_p8 }
  0x19   :  { %824 = shalt.err (!%p821_p10)
}
  0x1a   :  { %s825_s16 = scalar_lea.vmem %s20_s8, 512  ;;  %p830_p12 = scmp.lt.s32.totalorder %s20_s8, %s20_s8 }
  0x1b   :  { %p826_p11 = scmp.ne.s32.totalorder %s20_s8, %s825_s16  ;;  %p831_p13 = scmp.lt.s32.totalorder %s825_s16, %s825_s16 }
  0x1d   :  { %p832_p0 = por %p831_p13, %p830_p12 }
  0x1f   :  { %p833_p1 = pnand %p832_p0, %p826_p11 }
  0x21   :  { %836 = shalt.err (!%p833_p1)
}
  0x22   :  { %s891_s1 = smov 256   ;;  %s892_s17 = smov 16  }
  0x23   :  { %25 = dma.hbm_to_vmem [thread:$0]  %s993_s0, 512, %s20_s8, [#allocation4], %s891_s1, %s891_s1, %s892_s17  }
  0x24   :  { %s893_s20 = smov [#allocation8]   ;;  %s837_s24 = scalar_lea.hbm %s995_s2, 1024 }
  0x25   :  { %s43_s21 = sshll.u32 %s893_s20, 4  ;;  %p838_p2 = scmp.ne.s32.totalorder %s995_s2, %s837_s24  ;;  %s44_s21 = int_to_ptr.vmem [resolvable:$true] %s43_s21 }
  0x26   :  { %p841_p3 = scmp.lt.u32.totalorder %s837_s24, %s995_s2 }
  0x28   :  { %p843_p4 = pnand %p841_p3, %p838_p2 }
  0x2a   :  { %846 = shalt.err (!%p843_p4)
}
  0x2b   :  { %s847_s6 = scalar_lea.vmem %s44_s21, 1024  ;;  %p852_p6 = scmp.lt.s32.totalorder %s44_s21, %s44_s21 }
  0x2c   :  { %p848_p5 = scmp.ne.s32.totalorder %s44_s21, %s847_s6  ;;  %p853_p7 = scmp.lt.s32.totalorder %s847_s6, %s847_s6 }
  0x2e   :  { %p854_p8 = por %p853_p7, %p852_p6 }
  0x30   :  { %p855_p9 = pnand %p854_p8, %p848_p5 }
  0x32   :  { %858 = shalt.err (!%p855_p9)
}
  0x33   :  { %49 = dma.hbm_to_vmem [thread:$0]  %s995_s2, 1024, %s44_s21, [#allocation7], %s888_s28, %s888_s28, %s889_s29  }
  0x34   :  { %881 = dma.done.wait [#allocation4], 512  }
  0x35   :  { %882 = vsyncadd [#allocation4], 4294966784 }
  0x36   :  { %883 = dma.done.wait [#allocation7], 5120  }
  0x37   :  { %884 = vsyncadd [#allocation7], 4294962176  ;;  %v739_v0 = vld [vmem:[#allocation6 + $0x40] sm:$0xff]   ;;  %v743_v4 = vld [vmem:[#allocation6 + $0x48] sm:$0xff]   ;;  %v894_v34 = vmov 0.0   ;;  %vm895_vm0 = vmmov 0  }
  0x38   :  { %v740_v1 = vld [vmem:[#allocation6 + $0xc0] sm:$0xff]   ;;  %656 = vmatprep.subr.bf16.mxu0 %v739_v0  ;;  %v744_v5 = vld [vmem:[#allocation6 + $0xc8] sm:$0xff]   ;;  %v747_v8 = vld [vmem:[#allocation6 + $0x50] sm:$0xff]   ;;  %vm586_vm1 = vcmask 130112   ;;  %vm589_vm2 = vcmask 122880  }
  0x39   :  { %v741_v2 = vld [vmem:[#allocation6] sm:$0xff]   ;;  %678 = vmatprep.subr.bf16.mxu1 %v740_v1  ;;  %v745_v6 = vld [vmem:[#allocation6 + $0x8] sm:$0xff]   ;;  %v748_v9 = vld [vmem:[#allocation6 + $0xd0] sm:$0xff]  }
  0x3a   :  { %v742_v3 = vld [vmem:[#allocation6 + $0x80] sm:$0xff]   ;;  %657 = vmatpush3.bf16.msra.mxu0 %v741_v2  ;;  %v746_v7 = vld [vmem:[#allocation6 + $0x88] sm:$0xff]   ;;  %v749_v10 = vld [vmem:[#allocation6 + $0x10] sm:$0xff]  }
  0x3b   :  { %679 = vmatpush3.bf16.msra.mxu1 %v742_v3  ;;  %658 = vmatprep.subr.bf16.mxu0 %v743_v4  ;;  %v750_v11 = vld [vmem:[#allocation6 + $0x90] sm:$0xff]   ;;  %v751_v12 = vld [vmem:[#allocation6 + $0x58] sm:$0xff]   ;;  %v755_v16 = vld [vmem:[#allocation6 + $0x60] sm:$0xff]  }
  0x3c   :  { %680 = vmatprep.subr.bf16.mxu1 %v744_v5  ;;  %v752_v13 = vld [vmem:[#allocation6 + $0xd8] sm:$0xff]   ;;  %v756_v17 = vld [vmem:[#allocation6 + $0xe0] sm:$0xff]   ;;  %v759_v20 = vld [vmem:[#allocation6 + $0x68] sm:$0xff]  }
  0x3d   :  { %v753_v14 = vld [vmem:[#allocation6 + $0x18] sm:$0xff]   ;;  %v757_v18 = vld [vmem:[#allocation6 + $0x20] sm:$0xff]   ;;  %v760_v21 = vld [vmem:[#allocation6 + $0xe8] sm:$0xff]  }
  0x3e   :  { %659 = vmatpush3.bf16.msra.mxu0 %v745_v6  ;;  %v754_v15 = vld [vmem:[#allocation6 + $0x98] sm:$0xff]   ;;  %v758_v19 = vld [vmem:[#allocation6 + $0xa0] sm:$0xff]   ;;  %v761_v22 = vld [vmem:[#allocation6 + $0x28] sm:$0xff]  }
  0x3f   :  { %681 = vmatpush3.bf16.msra.mxu1 %v746_v7  ;;  %660 = vmatprep.subr.bf16.mxu0 %v747_v8  ;;  %v762_v23 = vld [vmem:[#allocation6 + $0xa8] sm:$0xff]   ;;  %v763_v24 = vld [vmem:[#allocation6 + $0x70] sm:$0xff]   ;;  %v767_v28 = vld [vmem:[#allocation6 + $0x78] sm:$0xff]  }
  0x40   :  { %682 = vmatprep.subr.bf16.mxu1 %v748_v9  ;;  %v764_v25 = vld [vmem:[#allocation6 + $0xf0] sm:$0xff]   ;;  %v768_v29 = vld [vmem:[#allocation6 + $0xf8] sm:$0xff]   ;;  %v777_v37 = vld [vmem:[#allocation8] sm:$0xff]  }
  0x41   :  { %v765_v26 = vld [vmem:[#allocation6 + $0x30] sm:$0xff]   ;;  %v769_v30 = vld [vmem:[#allocation6 + $0x38] sm:$0xff]   ;;  %v778_v38 = vld [vmem:[#allocation8 + $0x8] sm:$0xff]  }
  0x42   :  { %661 = vmatpush3.bf16.msra.mxu0 %v749_v10  ;;  %v766_v27 = vld [vmem:[#allocation6 + $0xb0] sm:$0xff]   ;;  %v770_v31 = vld [vmem:[#allocation6 + $0xb8] sm:$0xff]   ;;  %v781_v41 = vld [vmem:[#allocation8 + $0x20] sm:$0xff]  }
  0x43   :  { %683 = vmatpush3.bf16.msra.mxu1 %v750_v11  ;;  %662 = vmatprep.subr.bf16.mxu0 %v751_v12  ;;  %v771_v32 = vld [vmem:[#allocation3] ss:$16 sps:$4 sm:$0xff]   ;;  %v773_v33 = vld [vmem:[#allocation3 + $0x4] ss:$16 sps:$4 sm:$0xff]   ;;  %v774_v35 = vld [vmem:[#allocation3 + $0x8] ss:$16 sps:$4 sm:$0xff]  }
  0x44   :  { %684 = vmatprep.subr.bf16.mxu1 %v752_v13  ;;  %v776_v36 = vld [vmem:[#allocation3 + $0xc] ss:$16 sps:$4 sm:$0xff]   ;;  %383 = vmatprep.mubr.bf16.mxu0 %v773_v33  ;;  %v779_v39 = vld [vmem:[#allocation8 + $0x10] sm:$0xff]   ;;  %v607_v47 = vld [vmem:[%s996_s3] ss:$0 sm:$0xff]  ;;  %v558_v13 = vstv %s997_s4 }
  0x45   :  { %424 = vmatprep.mubr.bf16.mxu1 %v776_v36  ;;  %v780_v40 = vld [vmem:[#allocation8 + $0x18] sm:$0xff]   ;;  %v782_v42 = vld [vmem:[#allocation8 + $0x28] sm:$0xff]   ;;  %v783_v43 = vld [vmem:[#allocation8 + $0x30] sm:$0xff]  }
  0x46   :  { %663 = vmatpush3.bf16.msra.mxu0 %v753_v14  ;;  %v784_v44 = vld [vmem:[#allocation8 + $0x38] sm:$0xff]   ;;  %v644_v1 = vld [vmem:[%s996_s3 + $0x1] ss:$0 sm:$0xff]  ;;  %v653_v6 = vld [vmem:[%s996_s3 + $0x2] ss:$0 sm:$0xff]  ;;  %s896_s3 = smov [#allocation9]  }
  0x47   :  { %685 = vmatpush3.bf16.msra.mxu1 %v754_v15  ;;  %664 = vmatprep.subr.bf16.mxu0 %v755_v16  ;;  %s597_s4 = sshll.u32 %s896_s3, 4  ;;  %s598_s4 = int_to_ptr.vmem [resolvable:$true] %s597_s4 }
  0x48   :  { %686 = vmatprep.subr.bf16.mxu1 %v756_v17  ;;  %s859_s13 = scalar_lea.vmem %s598_s4, 16  ;;  %s863_s14 = scalar_lea.vmem %s598_s4, 32 }
  0x49   :  { %p860_p10 = scmp.ne.s32.totalorder %s598_s4, %s859_s13  ;;  %p864_p11 = scmp.lt.s32.totalorder %s598_s4, %s598_s4 }
  0x4a   :  { %665 = vmatpush3.bf16.msra.mxu0 %v757_v18  ;;  %p865_p12 = scmp.lt.s32.totalorder %s863_s14, %s859_s13 }
  0x4b   :  { %687 = vmatpush3.bf16.msra.mxu1 %v758_v19  ;;  %666 = vmatprep.subr.bf16.mxu0 %v759_v20 }
  0x4c   :  { %688 = vmatprep.subr.bf16.mxu1 %v760_v21  ;;  %p866_p13 = por %p865_p12, %p864_p11 }
  0x4e   :  { %667 = vmatpush3.bf16.msra.mxu0 %v761_v22  ;;  %p867_p0 = pnand %p866_p13, %p860_p10 }
  0x4f   :  { %689 = vmatpush3.bf16.msra.mxu1 %v762_v23  ;;  %668 = vmatprep.subr.bf16.mxu0 %v763_v24  ;;  %v575_v23 = vlaneseq }
  0x50   :  { %690 = vmatprep.subr.bf16.mxu1 %v764_v25 }
  0x51   :  { %v576_v25 = vand.u32 127, %v575_v23 }
  0x52   :  { %669 = vmatpush3.bf16.msra.mxu0 %v765_v26  ;;  %v578_v26 = vshrl.u32 %v575_v23, 7 }
  0x53   :  { %691 = vmatpush3.bf16.msra.mxu1 %v766_v27  ;;  %670 = vmatprep.subr.bf16.mxu0 %v767_v28  ;;  %v581_v27 = vadd.s32 4294967288, %v576_v25 }
  0x54   :  { %692 = vmatprep.subr.bf16.mxu1 %v768_v29  ;;  %v579_v28 = vsub.s32 %v576_v25, %v578_v26 }
  0x55   :  { %v584_v29 = vsub.s32 %v581_v27, %v578_v26 }
  0x56   :  { %671 = vmatpush3.bf16.msra.mxu0 %v769_v30 }
  0x57   :  { %693 = vmatpush3.bf16.msra.mxu1 %v770_v31  ;;  %709 = vmatprep.subr.bf16.mxu0 %v894_v34 }
  0x59   :  { %384 = vmatmul.mubr.bf16.vlgmr.msra.gmra.mrb[0].mxu0 %v771_v32 }
  0x5a   :  { %425 = vmatmul.mubr.bf16.vlgmr.msra.gmra.mrb[0].mxu1 %v774_v35  ;;  %710 = vmatpush3.bf16.msra.mxu0 %v777_v37 }
  0x5b   :  { %711 = vmatprep.subr.bf16.mxu0 %v894_v34  ;;  %725 = vmatprep.mubr.msk.bf16.mxu0 %vm895_vm0, %v894_v34 }
  0x5e   :  { %712 = vmatpush3.bf16.msra.mxu0 %v778_v38 }
  0x5f   :  { %713 = vmatprep.subr.bf16.mxu0 %v894_v34 }
  0x62   :  { %714 = vmatpush3.bf16.msra.mxu0 %v779_v39 }
  0x63   :  { %715 = vmatprep.subr.bf16.mxu0 %v894_v34 }
  0x66   :  { %716 = vmatpush3.bf16.msra.mxu0 %v780_v40 }
  0x67   :  { %717 = vmatprep.subr.bf16.mxu0 %v894_v34 }
  0x6a   :  { %718 = vmatpush3.bf16.msra.mxu0 %v781_v41 }
  0x6b   :  { %719 = vmatprep.subr.bf16.mxu0 %v894_v34 }
  0x6e   :  { %720 = vmatpush3.bf16.msra.mxu0 %v782_v42 }
  0x6f   :  { %721 = vmatprep.subr.bf16.mxu0 %v894_v34 }
  0x72   :  { %722 = vmatpush3.bf16.msra.mxu0 %v783_v43 }
  0x73   :  { %723 = vmatprep.subr.bf16.mxu0 %v894_v34 }
  0x76   :  { %724 = vmatpush3.bf16.msra.mxu0 %v784_v44 }
 0x12c   :  { %v672_v45 = vpop.f32.mrb[0].mxu0 }
 0x12d   :  { %v694_v46 = vpop.f32.mrb[0].mxu1  ;;  %v673_v48 = vpop.f32.mrb[1].mxu0 }
 0x12e   :  { %v674_v49 = vadd.f32 %v673_v48, %v672_v45  ;;  %v695_v50 = vpop.f32.mrb[1].mxu1  ;;  %v675_v51 = vpop.f32.mrb[2].mxu0 }
 0x12f   :  { %v696_v52 = vadd.f32 %v695_v50, %v694_v46  ;;  %v697_v53 = vpop.f32.mrb[2].mxu1  ;;  %v676_v54 = vpop.f32.mrb[3].mxu0 }
 0x130   :  { %v386_v55 = vadd.f32 %v674_v49, %v607_v47  ;;  %v677_v56 = vadd.f32 %v676_v54, %v675_v51  ;;  %v698_v57 = vpop.f32.mrb[3].mxu1 }
 0x131   :  { %v699_v58 = vadd.f32 %v698_v57, %v697_v53 }
 0x132   :  { %v427_v59 = vadd.f32 %v696_v52, %v386_v55  ;;  %v389_v60 = vadd.f32 %v677_v56, %v607_v47 }
 0x134   :  { %v430_v61 = vadd.f32 %v699_v58, %v389_v60  ;;  %v433_v62 = vmax.f32 %v427_v59, 0.0 }
 0x136   :  { %v434_v63 = vmax.f32 %v430_v61, 0.0 }
 0x138   :  { %v435_v0 = vpack.c.bf16 %v434_v63, %v433_v62 }
 0x13a   :  { %726 = vmatmul.mubr.bf16.vlgmr.msra.gmra.mrb[4].mxu0 %v435_v0 }
 0x20d   :  { %v538_v2 = vpop.f32.mrb[4].mxu0 }
 0x20e   :  { %v539_v3 = vadd.f32 %v644_v1, %v538_v2  ;;  %v727_v4 = vpop.f32.mrb[5].mxu0 }
 0x20f   :  { %v541_v5 = vpop.f32.mrb[6].mxu0 }
 0x210   :  { %v545_v7 = vmax.f32 %v539_v3, 0.0  ;;  %v542_v8 = vadd.f32 %v644_v1, %v541_v5  ;;  %v728_v9 = vpop.f32.mrb[7].mxu0 }
 0x212   :  { %v546_v10 = vmax.f32 %v542_v8, 0.0  ;;  %v551_v11 = vmul.f32 %v653_v6, %v545_v7 }
 0x214   :  { %553 = vadd.xlane.f32.xlu0 %v551_v11  ;;  %v552_v12 = vmul.f32 %v653_v6, %v546_v10 }
 0x218   :  { %555 = vadd.xlane.f32.xlu0 %v552_v12 }
 0x2a1   :  { %v554_v14 = vpop.xlane.xlu0 %553 }
 0x2a2   :  { %v559_v15 = vadd.f32 %v558_v13, %v554_v14 }
 0x2a4   :  { %v654_v16 = vmul.f32 -1.442695, %v559_v15 }
 0x2a5   :  { %v556_v17 = vpop.xlane.xlu0 %555 }
 0x2a6   :  { %785 = vpow2.f32 %v654_v16  ;;  %v560_v18 = vadd.f32 %v558_v13, %v556_v17 }
 0x2a8   :  { %v655_v19 = vmul.f32 -1.442695, %v560_v18 }
 0x2aa   :  { %787 = vpow2.f32 %v655_v19 }
 0x2b0   :  { %v786_v20 = vpop.eup %785 }
 0x2b1   :  { %v567_v21 = vadd.f32 1.0, %v786_v20 }
 0x2b3   :  { %789 = vrcp.f32 %v567_v21 }
 0x2b4   :  { %v788_v22 = vpop.eup %787 }
 0x2b5   :  { %v568_v24 = vadd.f32 1.0, %v788_v22 }
 0x2b7   :  { %791 = vrcp.f32 %v568_v24 }
 0x2bd   :  { %v790_v30 = vpop.eup %789 }
 0x2be   :  { %v580_v32 = vrot.slane %v790_v30, %v579_v28 }
 0x2c1   :  { %v792_v31 = vpop.eup %791 }
 0x2c2   :  { %v585_v33 = vrot.slane %v792_v31, %v584_v29 }
 0x2c4   :  { %v587_v34 = vsel %vm586_vm1, %v585_v33, %v580_v32 }
 0x2c5   :  { %590 = vst.msk [vmem:[#allocation9] sm:$0x1] %vm589_vm2, %v587_v34 }
 0x2c6   :  { %870 = shalt.err (!%p867_p0)
}
 0x2c7   :  { %s871_s1 = scalar_lea.hbm %s998_s5, 16 }
 0x2c8   :  { %p872_p1 = scmp.ne.s32.totalorder %s998_s5, %s871_s1  ;;  %p875_p2 = scmp.lt.u32.totalorder %s871_s1, %s998_s5 }
 0x2ca   :  { %p877_p3 = pnand %p875_p2, %p872_p1 }
 0x2cc   :  { %880 = shalt.err (!%p877_p3)
}
 0x2cd   :  { %600 = dma.vmem_to_hbm [thread:$0]  %s598_s4, 16, %s998_s5, [#allocation5]  }
 0x2ce   :  { %885 = dma.done.wait [#allocation5], 16  }
 0x2cf   :  { %886 = vsyncadd [#allocation5], 4294967280 }
 0x2d0   :  { %604 = vsyncpa [#allocation4], 1 }
 0x2d1   :  { %605 = vsyncpa [#allocation7], 1 }
 0x2d2   :  { %606 = vsyncpa [#allocation5], 1 }

</bundles_post_ra>
